<compile_context>
chip_gen: v7x
topology: tpu7x:2x2x1
jax: 0.10.0
libtpu: 0.0.40
codegen_flags: <defaults>
</compile_context>

<pallas_src>
import jax
import jax.numpy as jnp
from jax.experimental import pallas as pl
from jax.experimental.pallas import tpu as pltpu


def _make_conv_block_kernel(n, h, w, cin, cout, slab, lead):
    wp = w + 2
    kact = wp * cout          # stage-1 output / stage-2 input lane width
    nout = w * cout           # final (lane-dense) output lane width

    def kernel(x_ref, r1_ref, r2_ref, sb_ref, o_ref, a_ref):
        # x_ref : (n*(h+2), wp*cin)    padded input, one padded row / sublane-row
        # r1_ref: (3, wp*cin, wp*cout) banded stage-1 weights (one per dy)
        # r2_ref: (3, wp*cout, w*cout) banded stage-2 weights (one per dy)
        # sb_ref: (4, wp*cout) f32     rows = [s1, b1, s2 (padded), b2 (padded)]
        # o_ref : (n*h, w*cout) f32    lane-dense output
        # a_ref : (n*slab, wp*cout)    VMEM scratch: zero-padded stage-1 act.
        sb = sb_ref[...]

        # ---- stage 1: conv3x3 + BatchNorm + LeakyReLU --------------------
        y1 = None
        for dy in range(3):
            lhs = jnp.concatenate(
                [x_ref[i * (h + 2) + dy:i * (h + 2) + dy + h, :]
                 for i in range(n)], axis=0)                   # (n*h, wp*cin)
            t = jnp.dot(lhs, r1_ref[dy], preferred_element_type=jnp.float32)
            y1 = t if y1 is None else y1 + t                   # (n*h, wp*cout)
        y1 = y1 * sb[0:1, :] + sb[1:2, :]        # folded conv-bias + eval BN
        y1 = jnp.where(y1 > 0, y1, 0.01 * y1)    # LeakyReLU(0.01)
        # TODO(synk): nn.Dropout == eval-mode identity (no RNG masking).

        # Scatter into the zero-padded activation buffer (stays in VMEM).
        # Padding LANES are already exact zeros (zero weight columns + zero
        # bias on pad lanes); only the 2 halo ROWS per image need zeroing.
        for i in range(n):
            base = i * slab + lead
            a_ref[base:base + 1, :] = jnp.zeros((1, kact), a_ref.dtype)
            a_ref[base + h + 1:base + h + 2, :] = jnp.zeros((1, kact), a_ref.dtype)
            # Interior store starts at row i*slab + lead + 1 (multiple of 16).
            a_ref[base + 1:base + 1 + h, :] = (
                y1[i * h:(i + 1) * h, :].astype(a_ref.dtype))

        # ---- stage 2: conv3x3 + BatchNorm + LeakyReLU --------------------
        y2 = None
        for dy in range(3):
            lhs = jnp.concatenate(
                [a_ref[i * slab + lead + dy:i * slab + lead + dy + h, :]
                 for i in range(n)], axis=0)                   # (n*h, wp*cout)
            t = jnp.dot(lhs, r2_ref[dy], preferred_element_type=jnp.float32)
            y2 = t if y2 is None else y2 + t                   # (n*h, w*cout)
        y2 = y2 * sb[2:3, :nout] + sb[3:4, :nout]
        y2 = jnp.where(y2 > 0, y2, 0.01 * y2)
        o_ref[...] = y2.astype(o_ref.dtype)

    return kernel


def conv_block_forward(x_nchw, p, compute_dtype=jnp.float32, eps=1e-5):
    """ConvBlock.forward (eval mode). Input/output are NCHW to match PyTorch."""
    x = jnp.transpose(x_nchw, (0, 2, 3, 1)).astype(jnp.float32)   # NCHW -> NHWC
    n, h, w, cin = x.shape
    cout = p['w1'].shape[-1]
    wp = w + 2
    kin, kact, nout = wp * cin, wp * cout, w * cout
    lead = 15                                  # (lead+1) % 16 == 0 -> aligned store
    slab = -(-(lead + h + 2) // 16) * 16       # per-image row stride in scratch

    # ---- layout-only glue (XLA): padded rows, banded weights, folded BN ----
    xrow = jnp.pad(x, ((0, 0), (1, 1), (1, 1), (0, 0)))
    xrow = xrow.reshape(n * (h + 2), kin).astype(compute_dtype)

    xo = jnp.arange(1, w + 1)
    xc = jnp.arange(w)

    def band1(dx):   # padded-x (input) -> padded-x (output incl. zero pad cols)
        return jnp.zeros((wp, wp), jnp.float32).at[xo - 1 + dx, xo].set(1.0)

    def band2(dx):   # padded-x (input) -> compact-x (output)
        return jnp.zeros((wp, w), jnp.float32).at[xc + dx, xc].set(1.0)

    w1, w2 = p['w1'], p['w2']                      # HWIO (3,3,ci,co)
    r1 = jnp.stack([sum(jnp.kron(band1(dx), w1[dy, dx]) for dx in range(3))
                    for dy in range(3)]).astype(compute_dtype)   # (3, kin, kact)
    r2 = jnp.stack([sum(jnp.kron(band2(dx), w2[dy, dx]) for dx in range(3))
                    for dy in range(3)]).astype(compute_dtype)   # (3, kact, nout)

    def fold(g, be, m, v, b):                      # conv bias + eval-mode BN
        s = g / jnp.sqrt(v + eps)
        return s, be - m * s + b * s

    s1, b1c = fold(p['g1'], p['be1'], p['m1'], p['v1'], p['b1'])
    s2, b2c = fold(p['g2'], p['be2'], p['m2'], p['v2'], p['b2'])
    interior = jnp.repeat(
        ((jnp.arange(wp) >= 1) & (jnp.arange(wp) <= w)).astype(jnp.float32), cout)
    sb = jnp.zeros((4, kact), jnp.float32)
    sb = sb.at[0].set(jnp.tile(s1, wp))
    sb = sb.at[1].set(jnp.tile(b1c, wp) * interior)   # zero bias on pad lanes
    sb = sb.at[2, :nout].set(jnp.tile(s2, w))
    sb = sb.at[3, :nout].set(jnp.tile(b2c, w))

    kernel = _make_conv_block_kernel(n, h, w, cin, cout, slab, lead)
    out = pl.pallas_call(
        kernel,
        out_shape=jax.ShapeDtypeStruct((n * h, nout), jnp.float32),
        grid=(1,),
        in_specs=[
            pl.BlockSpec((n * (h + 2), kin), lambda i: (0, 0)),
            pl.BlockSpec((3, kin, kact), lambda i: (0, 0, 0)),
            pl.BlockSpec((3, kact, nout), lambda i: (0, 0, 0)),
            pl.BlockSpec((4, kact), lambda i: (0, 0)),
        ],
        out_specs=pl.BlockSpec((n * h, nout), lambda i: (0, 0)),
        scratch_shapes=[pltpu.VMEM((n * slab, kact), compute_dtype)],
        compiler_params=pltpu.CompilerParams(
            dimension_semantics=("arbitrary",)),
    )(xrow, r1, r2, sb)

    # (N*h, w*cout) -> (N,h,w,cout) is a contiguous reshape; then NHWC -> NCHW.
    return jnp.transpose(out.reshape(n, h, w, cout), (0, 3, 1, 2))


def _reference(x_nchw, p, eps=1e-5, quant_dtype=None):
    """Pure-JAX reference (XLA conv). quant_dtype=bfloat16 mimics the kernel's
    bf16 MXU inputs (with f32 accumulation) for a tight comparison."""
    def q(a):
        return a.astype(quant_dtype).astype(jnp.float32) if quant_dtype else a

    def block(x, w_hwio, b, g, be, m, v):
        y = jax.lax.conv_general_dilated(
            q(x), q(w_hwio), window_strides=(1, 1), padding='SAME',
            dimension_numbers=('NHWC', 'HWIO', 'NHWC'),
            precision=jax.lax.Precision.HIGHEST)
        y = y + b
        s = g / jnp.sqrt(v + eps)
        y = (y - m) * s + be
        return jnp.where(y > 0, y, 0.01 * y)

    x = jnp.transpose(x_nchw, (0, 2, 3, 1))
    y = block(x, p['w1'], p['b1'], p['g1'], p['be1'], p['m1'], p['v1'])
    y = block(y, p['w2'], p['b2'], p['g2'], p['be2'], p['m2'], p['v2'])
    return jnp.transpose(y, (0, 3, 1, 2))


def _init_params(key, cin, cout):
    ks = jax.random.split(key, 12)

    def u(k, shape, lo, hi):
        return jax.random.uniform(k, shape, jnp.float32, lo, hi)

    return {
        'w1': 0.1 * jax.random.normal(ks[0], (3, 3, cin, cout), jnp.float32),
        'b1': 0.1 * jax.random.normal(ks[1], (cout,), jnp.float32),
        'g1': u(ks[2], (cout,), 0.8, 1.2),
        'be1': 0.1 * jax.random.normal(ks[3], (cout,), jnp.float32),
        'm1': 0.1 * jax.random.normal(ks[4], (cout,), jnp.float32),
        'v1': u(ks[5], (cout,), 0.5, 1.5),
        'w2': 0.1 * jax.random.normal(ks[6], (3, 3, cout, cout), jnp.float32),
        'b2': 0.1 * jax.random.normal(ks[7], (cout,), jnp.float32),
        'g2': u(ks[8], (cout,), 0.8, 1.2),
        'be2': 0.1 * jax.random.normal(ks[9], (cout,), jnp.float32),
        'm2': 0.1 * jax.random.normal(ks[10], (cout,), jnp.float32),
        'v2': u(ks[11], (cout,), 0.5, 1.5),
    }


if __name__ == "__main__":
    key = jax.random.PRNGKey(0)
    k_x, k_p = jax.random.split(key)

    N, CIN, COUT, H, W = 2, 4, 8, 16, 16
    x = jax.random.normal(k_x, (N, CIN, H, W), jnp.float32)   # NCHW, like PyTorch
    params = _init_params(k_p, CIN, COUT)

    # 1) Tight structural check with the default f32 compute path.
    out_f32 = jax.block_until_ready(conv_block_forward(x, params))
    ref_f32 = jax.block_until_ready(_reference(x, params))
    assert out_f32.shape == (N, COUT, H, W), out_f32.shape
    assert jnp.allclose(out_f32, ref_f32, atol=1e-4, rtol=1e-4), (
        float(jnp.max(jnp.abs(out_f32 - ref_f32))))

    # 2) bf16 MXU path (for larger channel counts), compared against a
    #    reference that applies the same bf16 input quantization.
    out_bf16 = jax.block_until_ready(
        conv_block_forward(x, params, compute_dtype=jnp.bfloat16))
    ref_bf16 = jax.block_until_ready(
        _reference(x, params, quant_dtype=jnp.bfloat16))
    assert jnp.allclose(out_bf16, ref_bf16, atol=1e-2, rtol=1e-2), (
        float(jnp.max(jnp.abs(out_bf16 - ref_bf16))))

    print("KERNEL_OK")
</pallas_src>

<mosaic_0001>
module attributes {stable_mosaic.version = 11 : i64} {
  func.func @kernel(%arg0: i32, %arg1: memref<36x72xf32, #tpu.memory_space<vmem>>, %arg2: memref<3x72x144xf32, #tpu.memory_space<vmem>>, %arg3: memref<3x144x128xf32, #tpu.memory_space<vmem>>, %arg4: memref<4x144xf32, #tpu.memory_space<vmem>>, %arg5: memref<32x128xf32, #tpu.memory_space<vmem>>, %arg6: memref<96x144xf32, #tpu.memory_space<vmem>>) attributes {dimension_semantics = [#tpu.dimension_semantics<arbitrary>], iteration_bounds = array<i64: 1>, scalar_prefetch = 0 : i64, scratch_operands = 1 : i64, tpu.core_type = #tpu.core_type<tc>, window_params = [{pipeline_mode = #tpu.pipeline_mode<synchronous>, transform_indices = @transform_0, window_bounds = array<i64: 36, 72>}, {pipeline_mode = #tpu.pipeline_mode<synchronous>, transform_indices = @transform_1, window_bounds = array<i64: 3, 72, 144>}, {pipeline_mode = #tpu.pipeline_mode<synchronous>, transform_indices = @transform_2, window_bounds = array<i64: 3, 144, 128>}, {pipeline_mode = #tpu.pipeline_mode<synchronous>, transform_indices = @transform_3, window_bounds = array<i64: 4, 144>}, {pipeline_mode = #tpu.pipeline_mode<synchronous>, transform_indices = @transform_4, window_bounds = array<i64: 32, 128>}]} {
    %c0 = arith.constant 0 : index
    %c0_0 = arith.constant 0 : index
    %0 = vector.load %arg4[%c0, %c0_0] : memref<4x144xf32, #tpu.memory_space<vmem>>, vector<4x144xf32>
    %c0_1 = arith.constant 0 : index
    %c0_2 = arith.constant 0 : index
    %1 = vector.load %arg1[%c0_1, %c0_2] : memref<36x72xf32, #tpu.memory_space<vmem>>, vector<16x72xf32>
    %c18 = arith.constant 18 : index
    %c0_3 = arith.constant 0 : index
    %2 = vector.load %arg1[%c18, %c0_3] : memref<36x72xf32, #tpu.memory_space<vmem>>, vector<16x72xf32>
    %3 = tpu.concatenate %1, %2 in 0 : vector<16x72xf32>, vector<16x72xf32> -> vector<32x72xf32>
    %c0_4 = arith.constant 0 : index
    %c0_5 = arith.constant 0 : index
    %c0_6 = arith.constant 0 : index
    %4 = vector.load %arg2[%c0_4, %c0_5, %c0_6] : memref<3x72x144xf32, #tpu.memory_space<vmem>>, vector<1x72x144xf32>
    %5 = vector.shape_cast %4 : vector<1x72x144xf32> to vector<72x144xf32>
    %cst = arith.constant dense<0.000000e+00> : vector<32x144xf32>
    %6 = tpu.matmul %3, %5, %cst {dimension_numbers = #tpu.dot_dimension_numbers<[1], [0], [0], [1], [0, 0, 1, 1], [], []>} : vector<32x72xf32>, vector<72x144xf32>, vector<32x144xf32> -> vector<32x144xf32>
    %c1 = arith.constant 1 : index
    %c0_7 = arith.constant 0 : index
    %7 = vector.load %arg1[%c1, %c0_7] : memref<36x72xf32, #tpu.memory_space<vmem>>, vector<16x72xf32>
    %c19 = arith.constant 19 : index
    %c0_8 = arith.constant 0 : index
    %8 = vector.load %arg1[%c19, %c0_8] : memref<36x72xf32, #tpu.memory_space<vmem>>, vector<16x72xf32>
    %9 = tpu.concatenate %7, %8 in 0 : vector<16x72xf32>, vector<16x72xf32> -> vector<32x72xf32>
    %c1_9 = arith.constant 1 : index
    %c0_10 = arith.constant 0 : index
    %c0_11 = arith.constant 0 : index
    %10 = vector.load %arg2[%c1_9, %c0_10, %c0_11] : memref<3x72x144xf32, #tpu.memory_space<vmem>>, vector<1x72x144xf32>
    %11 = vector.shape_cast %10 : vector<1x72x144xf32> to vector<72x144xf32>
    %cst_12 = arith.constant dense<0.000000e+00> : vector<32x144xf32>
    %12 = tpu.matmul %9, %11, %cst_12 {dimension_numbers = #tpu.dot_dimension_numbers<[1], [0], [0], [1], [0, 0, 1, 1], [], []>} : vector<32x72xf32>, vector<72x144xf32>, vector<32x144xf32> -> vector<32x144xf32>
    %13 = arith.addf %6, %12 : vector<32x144xf32>
    %c2 = arith.constant 2 : index
    %c0_13 = arith.constant 0 : index
    %14 = vector.load %arg1[%c2, %c0_13] : memref<36x72xf32, #tpu.memory_space<vmem>>, vector<16x72xf32>
    %c20 = arith.constant 20 : index
    %c0_14 = arith.constant 0 : index
    %15 = vector.load %arg1[%c20, %c0_14] : memref<36x72xf32, #tpu.memory_space<vmem>>, vector<16x72xf32>
    %16 = tpu.concatenate %14, %15 in 0 : vector<16x72xf32>, vector<16x72xf32> -> vector<32x72xf32>
    %c2_15 = arith.constant 2 : index
    %c0_16 = arith.constant 0 : index
    %c0_17 = arith.constant 0 : index
    %17 = vector.load %arg2[%c2_15, %c0_16, %c0_17] : memref<3x72x144xf32, #tpu.memory_space<vmem>>, vector<1x72x144xf32>
    %18 = vector.shape_cast %17 : vector<1x72x144xf32> to vector<72x144xf32>
    %cst_18 = arith.constant dense<0.000000e+00> : vector<32x144xf32>
    %19 = tpu.matmul %16, %18, %cst_18 {dimension_numbers = #tpu.dot_dimension_numbers<[1], [0], [0], [1], [0, 0, 1, 1], [], []>} : vector<32x72xf32>, vector<72x144xf32>, vector<32x144xf32> -> vector<32x144xf32>
    %20 = arith.addf %13, %19 : vector<32x144xf32>
    %21 = vector.extract_strided_slice %0 {offsets = [0, 0], sizes = [1, 144], strides = [1, 1]} : vector<4x144xf32> to vector<1x144xf32>
    %22 = vector.broadcast %21 : vector<1x144xf32> to vector<32x144xf32>
    %23 = arith.mulf %20, %22 : vector<32x144xf32>
    %24 = vector.extract_strided_slice %0 {offsets = [1, 0], sizes = [1, 144], strides = [1, 1]} : vector<4x144xf32> to vector<1x144xf32>
    %25 = vector.broadcast %24 : vector<1x144xf32> to vector<32x144xf32>
    %26 = arith.addf %23, %25 : vector<32x144xf32>
    %cst_19 = arith.constant 0.000000e+00 : f32
    %27 = vector.broadcast %cst_19 : f32 to vector<32x144xf32>
    %28 = arith.cmpf ogt, %26, %27 : vector<32x144xf32>
    %cst_20 = arith.constant 0.00999999977 : f32
    %29 = vector.broadcast %cst_20 : f32 to vector<32x144xf32>
    %30 = arith.mulf %29, %26 : vector<32x144xf32>
    %31 = arith.select %28, %26, %30 : vector<32x144xi1>, vector<32x144xf32>
    %cst_21 = arith.constant 0.000000e+00 : f32
    %32 = vector.broadcast %cst_21 : f32 to vector<1x144xf32>
    %c15 = arith.constant 15 : index
    %c0_22 = arith.constant 0 : index
    %33 = vector.load %arg6[%c15, %c0_22] : memref<96x144xf32, #tpu.memory_space<vmem>>, vector<1x144xf32>
    tpu.vector_store %arg6[%c15, %c0_22], %32 {strides = array<i32>} : memref<96x144xf32, #tpu.memory_space<vmem>>, vector<1x144xf32>,
    %cst_23 = arith.constant 0.000000e+00 : f32
    %34 = vector.broadcast %cst_23 : f32 to vector<1x144xf32>
    %c32 = arith.constant 32 : index
    %c0_24 = arith.constant 0 : index
    %35 = vector.load %arg6[%c32, %c0_24] : memref<96x144xf32, #tpu.memory_space<vmem>>, vector<1x144xf32>
    tpu.vector_store %arg6[%c32, %c0_24], %34 {strides = array<i32>} : memref<96x144xf32, #tpu.memory_space<vmem>>, vector<1x144xf32>,
    %36 = vector.extract_strided_slice %31 {offsets = [0, 0], sizes = [16, 144], strides = [1, 1]} : vector<32x144xf32> to vector<16x144xf32>
    %c16 = arith.constant 16 : index
    %c0_25 = arith.constant 0 : index
    %37 = vector.load %arg6[%c16, %c0_25] : memref<96x144xf32, #tpu.memory_space<vmem>>, vector<16x144xf32>
    tpu.vector_store %arg6[%c16, %c0_25], %36 {strides = array<i32>} : memref<96x144xf32, #tpu.memory_space<vmem>>, vector<16x144xf32>,
    %cst_26 = arith.constant 0.000000e+00 : f32
    %38 = vector.broadcast %cst_26 : f32 to vector<1x144xf32>
    %c63 = arith.constant 63 : index
    %c0_27 = arith.constant 0 : index
    %39 = vector.load %arg6[%c63, %c0_27] : memref<96x144xf32, #tpu.memory_space<vmem>>, vector<1x144xf32>
    tpu.vector_store %arg6[%c63, %c0_27], %38 {strides = array<i32>} : memref<96x144xf32, #tpu.memory_space<vmem>>, vector<1x144xf32>,
    %cst_28 = arith.constant 0.000000e+00 : f32
    %40 = vector.broadcast %cst_28 : f32 to vector<1x144xf32>
    %c80 = arith.constant 80 : index
    %c0_29 = arith.constant 0 : index
    %41 = vector.load %arg6[%c80, %c0_29] : memref<96x144xf32, #tpu.memory_space<vmem>>, vector<1x144xf32>
    tpu.vector_store %arg6[%c80, %c0_29], %40 {strides = array<i32>} : memref<96x144xf32, #tpu.memory_space<vmem>>, vector<1x144xf32>,
    %42 = vector.extract_strided_slice %31 {offsets = [16, 0], sizes = [16, 144], strides = [1, 1]} : vector<32x144xf32> to vector<16x144xf32>
    %c64 = arith.constant 64 : index
    %c0_30 = arith.constant 0 : index
    %43 = vector.load %arg6[%c64, %c0_30] : memref<96x144xf32, #tpu.memory_space<vmem>>, vector<16x144xf32>
    tpu.vector_store %arg6[%c64, %c0_30], %42 {strides = array<i32>} : memref<96x144xf32, #tpu.memory_space<vmem>>, vector<16x144xf32>,
    %c15_31 = arith.constant 15 : index
    %c0_32 = arith.constant 0 : index
    %44 = vector.load %arg6[%c15_31, %c0_32] : memref<96x144xf32, #tpu.memory_space<vmem>>, vector<16x144xf32>
    %c63_33 = arith.constant 63 : index
    %c0_34 = arith.constant 0 : index
    %45 = vector.load %arg6[%c63_33, %c0_34] : memref<96x144xf32, #tpu.memory_space<vmem>>, vector<16x144xf32>
    %46 = tpu.concatenate %44, %45 in 0 : vector<16x144xf32>, vector<16x144xf32> -> vector<32x144xf32>
    %c0_35 = arith.constant 0 : index
    %c0_36 = arith.constant 0 : index
    %c0_37 = arith.constant 0 : index
    %47 = vector.load %arg3[%c0_35, %c0_36, %c0_37] : memref<3x144x128xf32, #tpu.memory_space<vmem>>, vector<1x144x128xf32>
    %48 = vector.shape_cast %47 : vector<1x144x128xf32> to vector<144x128xf32>
    %cst_38 = arith.constant dense<0.000000e+00> : vector<32x128xf32>
    %49 = tpu.matmul %46, %48, %cst_38 {dimension_numbers = #tpu.dot_dimension_numbers<[1], [0], [0], [1], [0, 0, 1, 1], [], []>} : vector<32x144xf32>, vector<144x128xf32>, vector<32x128xf32> -> vector<32x128xf32>
    %c16_39 = arith.constant 16 : index
    %c0_40 = arith.constant 0 : index
    %50 = vector.load %arg6[%c16_39, %c0_40] : memref<96x144xf32, #tpu.memory_space<vmem>>, vector<16x144xf32>
    %c64_41 = arith.constant 64 : index
    %c0_42 = arith.constant 0 : index
    %51 = vector.load %arg6[%c64_41, %c0_42] : memref<96x144xf32, #tpu.memory_space<vmem>>, vector<16x144xf32>
    %52 = tpu.concatenate %50, %51 in 0 : vector<16x144xf32>, vector<16x144xf32> -> vector<32x144xf32>
    %c1_43 = arith.constant 1 : index
    %c0_44 = arith.constant 0 : index
    %c0_45 = arith.constant 0 : index
    %53 = vector.load %arg3[%c1_43, %c0_44, %c0_45] : memref<3x144x128xf32, #tpu.memory_space<vmem>>, vector<1x144x128xf32>
    %54 = vector.shape_cast %53 : vector<1x144x128xf32> to vector<144x128xf32>
    %cst_46 = arith.constant dense<0.000000e+00> : vector<32x128xf32>
    %55 = tpu.matmul %52, %54, %cst_46 {dimension_numbers = #tpu.dot_dimension_numbers<[1], [0], [0], [1], [0, 0, 1, 1], [], []>} : vector<32x144xf32>, vector<144x128xf32>, vector<32x128xf32> -> vector<32x128xf32>
    %56 = arith.addf %49, %55 : vector<32x128xf32>
    %c17 = arith.constant 17 : index
    %c0_47 = arith.constant 0 : index
    %57 = vector.load %arg6[%c17, %c0_47] : memref<96x144xf32, #tpu.memory_space<vmem>>, vector<16x144xf32>
    %c65 = arith.constant 65 : index
    %c0_48 = arith.constant 0 : index
    %58 = vector.load %arg6[%c65, %c0_48] : memref<96x144xf32, #tpu.memory_space<vmem>>, vector<16x144xf32>
    %59 = tpu.concatenate %57, %58 in 0 : vector<16x144xf32>, vector<16x144xf32> -> vector<32x144xf32>
    %c2_49 = arith.constant 2 : index
    %c0_50 = arith.constant 0 : index
    %c0_51 = arith.constant 0 : index
    %60 = vector.load %arg3[%c2_49, %c0_50, %c0_51] : memref<3x144x128xf32, #tpu.memory_space<vmem>>, vector<1x144x128xf32>
    %61 = vector.shape_cast %60 : vector<1x144x128xf32> to vector<144x128xf32>
    %cst_52 = arith.constant dense<0.000000e+00> : vector<32x128xf32>
    %62 = tpu.matmul %59, %61, %cst_52 {dimension_numbers = #tpu.dot_dimension_numbers<[1], [0], [0], [1], [0, 0, 1, 1], [], []>} : vector<32x144xf32>, vector<144x128xf32>, vector<32x128xf32> -> vector<32x128xf32>
    %63 = arith.addf %56, %62 : vector<32x128xf32>
    %64 = vector.extract_strided_slice %0 {offsets = [2, 0], sizes = [1, 128], strides = [1, 1]} : vector<4x144xf32> to vector<1x128xf32>
    %65 = vector.broadcast %64 : vector<1x128xf32> to vector<32x128xf32>
    %66 = arith.mulf %63, %65 : vector<32x128xf32>
    %67 = vector.extract_strided_slice %0 {offsets = [3, 0], sizes = [1, 128], strides = [1, 1]} : vector<4x144xf32> to vector<1x128xf32>
    %68 = vector.broadcast %67 : vector<1x128xf32> to vector<32x128xf32>
    %69 = arith.addf %66, %68 : vector<32x128xf32>
    %cst_53 = arith.constant 0.000000e+00 : f32
    %70 = vector.broadcast %cst_53 : f32 to vector<32x128xf32>
    %71 = arith.cmpf ogt, %69, %70 : vector<32x128xf32>
    %cst_54 = arith.constant 0.00999999977 : f32
    %72 = vector.broadcast %cst_54 : f32 to vector<32x128xf32>
    %73 = arith.mulf %72, %69 : vector<32x128xf32>
    %74 = arith.select %71, %69, %73 : vector<32x128xi1>, vector<32x128xf32>
    %c0_55 = arith.constant 0 : index
    %c0_56 = arith.constant 0 : index
    %75 = vector.load %arg5[%c0_55, %c0_56] : memref<32x128xf32, #tpu.memory_space<vmem>>, vector<32x128xf32>
    tpu.vector_store %arg5[%c0_55, %c0_56], %74 {strides = array<i32>} : memref<32x128xf32, #tpu.memory_space<vmem>>, vector<32x128xf32>,
    return
  }
  func.func @transform_0(%arg0: i32) -> (i32, i32) {
    %c0_i32 = arith.constant 0 : i32
    %c0_i32_0 = arith.constant 0 : i32
    %c0_i32_1 = arith.constant 0 : i32
    return %c0_i32, %c0_i32_0 : i32, i32
  }
  func.func @transform_1(%arg0: i32) -> (i32, i32, i32) {
    %c0_i32 = arith.constant 0 : i32
    %c0_i32_0 = arith.constant 0 : i32
    %c0_i32_1 = arith.constant 0 : i32
    %c0_i32_2 = arith.constant 0 : i32
    return %c0_i32, %c0_i32_0, %c0_i32_1 : i32, i32, i32
  }
  func.func @transform_2(%arg0: i32) -> (i32, i32, i32) {
    %c0_i32 = arith.constant 0 : i32
    %c0_i32_0 = arith.constant 0 : i32
    %c0_i32_1 = arith.constant 0 : i32
    %c0_i32_2 = arith.constant 0 : i32
    return %c0_i32, %c0_i32_0, %c0_i32_1 : i32, i32, i32
  }
  func.func @transform_3(%arg0: i32) -> (i32, i32) {
    %c0_i32 = arith.constant 0 : i32
    %c0_i32_0 = arith.constant 0 : i32
    %c0_i32_1 = arith.constant 0 : i32
    return %c0_i32, %c0_i32_0 : i32, i32
  }
  func.func @transform_4(%arg0: i32) -> (i32, i32) {
    %c0_i32 = arith.constant 0 : i32
    %c0_i32_0 = arith.constant 0 : i32
    %c0_i32_1 = arith.constant 0 : i32
    return %c0_i32, %c0_i32_0 : i32, i32
  }
}

</mosaic_0001>

<bundles_post_ra>
// kernel: tpu_custom_call.1
= control target key start
LH: loop header
LB: loop body
LE: loop exit
PB: predicated region body
PF: predicated region fallthrough
CT: control target
= control target key end

     0   :  { %9 = vsyncpa [#allocation4], 0  ;;  %s1546_s0 = inlined_call_operand.hbm [shape: f32[36,72], index: 0, kind: input, shape index: {}]   ;;  %s1547_s1 = inlined_call_operand.hbm [shape: f32[3,72,144], index: 1, kind: input, shape index: {}]   ;;  %s1548_s2 = inlined_call_operand.hbm [shape: f32[3,144,128], index: 2, kind: input, shape index: {}]   ;;  %s1549_s3 = inlined_call_operand.vmem [shape: f32[4,144], index: 3, kind: input, shape index: {}]   ;;  %s1550_s4 = inlined_call_operand.hbm [shape: f32[32,128], index: 4, kind: output, shape index: {}]  }
   0x1   :  { %10 = vsyncpa [#allocation7], 0 }
   0x2   :  { %11 = vsyncpa [#allocation5], 0  ;;  %s1320_s15 = smov [#allocation6]   ;;  %s1226_s19 = scalar_lea.hbm %s1547_s1, 6912 }
   0x3   :  { %s29_s16 = sshll.u32 %s1320_s15, 4  ;;  %p1227_p0 = scmp.ne.s32.totalorder %s1547_s1, %s1226_s19  ;;  %s30_s16 = int_to_ptr.vmem [resolvable:$true] %s29_s16 }
   0x4   :  { %p1230_p1 = scmp.lt.u32.totalorder %s1226_s19, %s1547_s1 }
   0x6   :  { %p1232_p2 = pnand %p1230_p1, %p1227_p0 }
   0x8   :  { %1235 = shalt.err (!%p1232_p2)
}
   0x9   :  { %s1236_s24 = scalar_lea.vmem %s30_s16, 6912  ;;  %p1241_p4 = scmp.lt.s32.totalorder %s30_s16, %s30_s16 }
   0xa   :  { %p1237_p3 = scmp.ne.s32.totalorder %s30_s16, %s1236_s24  ;;  %p1242_p5 = scmp.lt.s32.totalorder %s1236_s24, %s1236_s24 }
   0xc   :  { %p1243_p6 = por %p1242_p5, %p1241_p4 }
   0xe   :  { %p1244_p7 = pnand %p1243_p6, %p1237_p3 }
  0x10   :  { %1247 = shalt.err (!%p1244_p7)
}
  0x11   :  { %s1321_s25 = smov 256   ;;  %s1322_s26 = smov 16  }
  0x12   :  { %35 = dma.hbm_to_vmem [thread:$0]  %s1547_s1, 6912, %s30_s16, [#allocation7], %s1321_s25, %s1321_s25, %s1322_s26  }
  0x13   :  { %s1323_s29 = smov [#allocation3]   ;;  %s1248_s7 = scalar_lea.hbm %s1546_s0, 640 }
  0x14   :  { %s17_s30 = sshll.u32 %s1323_s29, 4  ;;  %p1249_p8 = scmp.ne.s32.totalorder %s1546_s0, %s1248_s7  ;;  %s18_s30 = int_to_ptr.vmem [resolvable:$true] %s17_s30 }
  0x15   :  { %p1252_p9 = scmp.lt.u32.totalorder %s1248_s7, %s1546_s0 }
  0x17   :  { %p1254_p10 = pnand %p1252_p9, %p1249_p8 }
  0x19   :  { %1257 = shalt.err (!%p1254_p10)
}
  0x1a   :  { %s1258_s12 = scalar_lea.vmem %s18_s30, 640  ;;  %p1263_p12 = scmp.lt.s32.totalorder %s18_s30, %s18_s30 }
  0x1b   :  { %p1259_p11 = scmp.ne.s32.totalorder %s18_s30, %s1258_s12  ;;  %p1264_p13 = scmp.lt.s32.totalorder %s1258_s12, %s1258_s12 }
  0x1d   :  { %p1265_p0 = por %p1264_p13, %p1263_p12 }
  0x1f   :  { %p1266_p1 = pnand %p1265_p0, %p1259_p11 }
  0x21   :  { %1269 = shalt.err (!%p1266_p1)
}
  0x22   :  { %s1324_s1 = smov 128   ;;  %s1325_s13 = smov 8  }
  0x23   :  { %23 = dma.hbm_to_vmem [thread:$0]  %s1546_s0, 640, %s18_s30, [#allocation4], %s1324_s1, %s1324_s1, %s1325_s13  }
  0x24   :  { %s1326_s16 = smov [#allocation8]   ;;  %s1270_s20 = scalar_lea.hbm %s1548_s2, 6912 }
  0x25   :  { %s41_s17 = sshll.u32 %s1326_s16, 4  ;;  %p1271_p2 = scmp.ne.s32.totalorder %s1548_s2, %s1270_s20  ;;  %s42_s17 = int_to_ptr.vmem [resolvable:$true] %s41_s17 }
  0x26   :  { %p1274_p3 = scmp.lt.u32.totalorder %s1270_s20, %s1548_s2 }
  0x28   :  { %p1276_p4 = pnand %p1274_p3, %p1271_p2 }
  0x2a   :  { %1279 = shalt.err (!%p1276_p4)
}
  0x2b   :  { %s1280_s25 = scalar_lea.vmem %s42_s17, 6912  ;;  %p1285_p6 = scmp.lt.s32.totalorder %s42_s17, %s42_s17 }
  0x2c   :  { %p1281_p5 = scmp.ne.s32.totalorder %s42_s17, %s1280_s25  ;;  %p1286_p7 = scmp.lt.s32.totalorder %s1280_s25, %s1280_s25 }
  0x2e   :  { %p1287_p8 = por %p1286_p7, %p1285_p6 }
  0x30   :  { %p1288_p9 = pnand %p1287_p8, %p1281_p5 }
  0x32   :  { %1291 = shalt.err (!%p1288_p9)
}
  0x33   :  { %47 = dma.hbm_to_vmem [thread:$0]  %s1548_s2, 6912, %s42_s17, [#allocation7], %s1324_s1, %s1324_s1, %s1325_s13  }
  0x34   :  { %1314 = dma.done.wait [#allocation4], 640  }
  0x35   :  { %1315 = vsyncadd [#allocation4], 4294966656 }
  0x36   :  { %1316 = dma.done.wait [#allocation7], 13824  }
  0x37   :  { %1317 = vsyncadd [#allocation7], 4294953472  ;;  %v1327_v0 = vmov 0.0   ;;  %v1328_v1 = vmov 0.0|0.0   ;;  %v88_v2 = vld [vmem:[#allocation6 + $0x98] sm:$0xff]  ;;  %v90_v3 = vld [vmem:[#allocation6 + $0xa8] sm:$0xff] }
  0x38   :  { %182 = vmatprep.mubr.f32.mxu0 %v1327_v0  ;;  %1134 = vmatprep.subr.bf16.mxu1 %v1328_v1  ;;  %v87_v4 = vld [vmem:[#allocation6 + $0x90] sm:$0xff]  ;;  %v1059_v5 = vpack.c.bf16 %v90_v3, %v88_v2  ;;  %v89_v6 = vld [vmem:[#allocation6 + $0xa0] sm:$0xff]  ;;  %v92_v7 = vld [vmem:[#allocation6 + $0xb8] sm:$0xff]  ;;  %vm105_vm0 = vcmask 588800   ;;  %vm528_vm4 = vcmask 130048   ;;  %vm560_vm10 = vcmask 1040384  }
  0x39   :  { %v94_v8 = vld [vmem:[#allocation6 + $0xc8] sm:$0xff]  ;;  %v1061_v9 = vpack.c.bf16 %v89_v6, %v87_v4  ;;  %v91_v11 = vld [vmem:[#allocation6 + $0xb0] sm:$0xff]  ;;  %v93_v12 = vld [vmem:[#allocation6 + $0xc0] sm:$0xff]  ;;  %vm838_vm12 = vcmask 1046528  }
  0x3a   :  { %v1063_v10 = vpack.c.bf16 %v94_v8, %v92_v7  ;;  %v96_v13 = vld [vmem:[#allocation6 + $0xd8] sm:$0xff]  ;;  %1060 = vmatprep.subr.bf16.mxu0 %v1059_v5  ;;  %v98_v14 = vld [vmem:[#allocation6 + $0xe8] sm:$0xff]  ;;  %v1065_v15 = vpack.c.bf16 %v93_v12, %v91_v11  ;;  %v95_v17 = vld [vmem:[#allocation6 + $0xd0] sm:$0xff] }
  0x3b   :  { %1062 = vmatpush1.bf16.msra.mxu0 %v1061_v9  ;;  %v1067_v16 = vpack.c.bf16 %v98_v14, %v96_v13  ;;  %v97_v18 = vld [vmem:[#allocation6 + $0xe0] sm:$0xff]  ;;  %v100_v19 = vld [vmem:[#allocation6 + $0xf8] sm:$0xff]  ;;  %v102_v20 = vld [vmem:[#allocation6 + $0x108] sm:$0xff] }
  0x3c   :  { %1064 = vmatprep.subr.bf16.mxu0 %v1063_v10  ;;  %v1069_v21 = vpack.c.bf16 %v97_v18, %v95_v17  ;;  %v1071_v22 = vpack.c.bf16 %v102_v20, %v100_v19  ;;  %v99_v23 = vld [vmem:[#allocation6 + $0xf0] sm:$0xff]  ;;  %v101_v24 = vld [vmem:[#allocation6 + $0x100] sm:$0xff]  ;;  %v104_v26 = vld [vmem:[#allocation6 + $0x118] sm:$0xff] }
  0x3d   :  { %v1073_v25 = vpack.c.bf16 %v101_v24, %v99_v23  ;;  %v65_v27 = vld [vmem:[#allocation6 + $0x8] sm:$0xff]  ;;  %v67_v28 = vld [vmem:[#allocation6 + $0x18] sm:$0xff]  ;;  %v64_v29 = vld [vmem:[#allocation6] sm:$0xff] }
  0x3e   :  { %v66_v30 = vld [vmem:[#allocation6 + $0x10] sm:$0xff]  ;;  %v69_v31 = vld [vmem:[#allocation6 + $0x28] sm:$0xff]  ;;  %v71_v32 = vld [vmem:[#allocation6 + $0x38] sm:$0xff]  ;;  %v1075_v34 = vpack.c.bf16 %v67_v28, %v65_v27 }
  0x3f   :  { %1066 = vmatpush1.bf16.msra.mxu0 %v1065_v15  ;;  %v103_v33 = vld [vmem:[#allocation6 + $0x110] sm:$0xff]  ;;  %v82_v35 = vld [vmem:[#allocation3 + $0x1] sm:$0xff]  ;;  %v1077_v36 = vpack.c.bf16 %v66_v30, %v64_v29  ;;  %v1079_v37 = vpack.c.bf16 %v71_v32, %v69_v31  ;;  %v73_v40 = vld [vmem:[#allocation6 + $0x48] sm:$0xff] }
  0x40   :  { %1068 = vmatprep.subr.bf16.mxu0 %v1067_v16  ;;  %v68_v38 = vld [vmem:[#allocation6 + $0x20] sm:$0xff]  ;;  %v70_v39 = vld [vmem:[#allocation6 + $0x30] sm:$0xff]  ;;  %v75_v41 = vld [vmem:[#allocation6 + $0x58] sm:$0xff] }
  0x41   :  { %v1081_v42 = vpack.c.bf16 %v70_v39, %v68_v38  ;;  %v83_v43 = vld [vmem:[#allocation3 + $0x9] sm:$0xff]  ;;  %v591_v45 = vld [vmem:[#allocation8] sm:$0xff]  ;;  %v1083_v46 = vpack.c.bf16 %v75_v41, %v73_v40  ;;  %v592_v49 = vld [vmem:[#allocation8 + $0x8] sm:$0xff] }
  0x42   :  { %v72_v44 = vld [vmem:[#allocation6 + $0x40] sm:$0xff]  ;;  %v74_v47 = vld [vmem:[#allocation6 + $0x50] sm:$0xff]  ;;  %v77_v48 = vld [vmem:[#allocation6 + $0x68] sm:$0xff]  ;;  %v1135_v51 = vpack.c.bf16 %v592_v49, %v591_v45 }
  0x43   :  { %1070 = vmatpush1.bf16.msra.mxu0 %v1069_v21  ;;  %v79_v50 = vld [vmem:[#allocation6 + $0x78] sm:$0xff]  ;;  %v593_v52 = vld [vmem:[#allocation8 + $0x10] sm:$0xff]  ;;  %v594_v53 = vld [vmem:[#allocation8 + $0x18] sm:$0xff]  ;;  %v1085_v54 = vpack.c.bf16 %v74_v47, %v72_v44 }
  0x44   :  { %1072 = vmatprep.subr.bf16.mxu0 %v1071_v22  ;;  %v84_v55 = vld [vmem:[#allocation3 + $0x13] sm:$0xff]  ;;  %v1087_v56 = vpack.c.bf16 %v79_v50, %v77_v48  ;;  %v76_v57 = vld [vmem:[#allocation6 + $0x60] sm:$0xff]  ;;  %1136 = vmatpush1.bf16.msra.mxu1 %v1135_v51  ;;  %v1138_v59 = vpack.c.bf16 %v594_v53, %v593_v52  ;;  %v596_v61 = vld [vmem:[#allocation8 + $0x28] sm:$0xff] }
  0x45   :  { %v78_v58 = vld [vmem:[#allocation6 + $0x70] sm:$0xff]  ;;  %1137 = vmatprep.subr.bf16.mxu1 %v1328_v1  ;;  %v81_v3 = vld [vmem:[#allocation6 + $0x88] sm:$0xff]  ;;  %v316_v5 = vld [vmem:[#allocation6 + $0x138] sm:$0xff] }
  0x46   :  { %v595_v60 = vld [vmem:[#allocation8 + $0x20] sm:$0xff]  ;;  %v1089_v62 = vpack.c.bf16 %v78_v58, %v76_v57  ;;  %v314_v4 = vld [vmem:[#allocation6 + $0x128] sm:$0xff]  ;;  %v313_v6 = vld [vmem:[#allocation6 + $0x120] sm:$0xff]  ;;  %v441_v57 = vlaneseq }
  0x47   :  { %1074 = vmatpush1.bf16.msra.mxu0 %v1073_v25  ;;  %v85_v63 = vld [vmem:[#allocation3 + $0x1b] sm:$0xff]  ;;  %v1141_v2 = vpack.c.bf16 %v596_v61, %v595_v60  ;;  %v318_v8 = vld [vmem:[#allocation6 + $0x148] sm:$0xff]  ;;  %v597_v10 = vld [vmem:[#allocation8 + $0x30] sm:$0xff]  ;;  %v1091_v13 = vpack.c.bf16 %v316_v5, %v314_v4 }
  0x48   :  { %134 = vmatprep.subr.mxu0 %v104_v26  ;;  %1139 = vmatpush1.bf16.msra.mxu1 %v1138_v59  ;;  %v315_v7 = vld [vmem:[#allocation6 + $0x130] sm:$0xff]  ;;  %v320_v9 = vld [vmem:[#allocation6 + $0x158] sm:$0xff]  ;;  %v598_v11 = vld [vmem:[#allocation8 + $0x38] sm:$0xff]  ;;  %vm519_vm1 = vcmp.lt.s32.totalorder %v441_v57, 144 }
  0x49   :  { %1140 = vmatprep.subr.bf16.mxu1 %v1328_v1  ;;  %v80_v12 = vld [vmem:[#allocation6 + $0x80] sm:$0xff]  ;;  %v60_v14 = vld [vmem:[#allocation3] sm:$0xff]  ;;  %v1093_v15 = vpack.c.bf16 %v315_v7, %v313_v6  ;;  %v1095_v16 = vpack.c.bf16 %v320_v9, %v318_v8  ;;  %v319_v18 = vld [vmem:[#allocation6 + $0x150] sm:$0xff]  ;;  %v1144_v19 = vpack.c.bf16 %v598_v11, %v597_v10  ;;  %525 = vst.msk [vmem:[#allocation2 + $0x40] ss:$8 sm:$0x3] %vm519_vm1, %v1327_v0 }
  0x4a   :  { %v317_v17 = vld [vmem:[#allocation6 + $0x140] sm:$0xff]  ;;  %v322_v20 = vld [vmem:[#allocation6 + $0x168] sm:$0xff]  ;;  %v324_v21 = vld [vmem:[#allocation6 + $0x178] sm:$0xff]  ;;  %533 = vst.msk [vmem:[#allocation2 + $0x77] ss:$8 sm:$0x3] %vm519_vm1, %v1327_v0 }
  0x4b   :  { %135 = vmatpush1.msra.mxu0 %v103_v33  ;;  %v1097_v22 = vpack.c.bf16 %v319_v18, %v317_v17  ;;  %v61_v23 = vld [vmem:[#allocation3 + $0x8] sm:$0xff]  ;;  %v1099_v24 = vpack.c.bf16 %v324_v21, %v322_v20  ;;  %v323_v26 = vld [vmem:[#allocation6 + $0x170] sm:$0xff]  ;;  %v326_v27 = vld [vmem:[#allocation6 + $0x188] sm:$0xff]  ;;  %536 = vst.msk [vmem:[#allocation2 + $0xa0] ss:$8 sm:$0x3] %vm519_vm1, %v1327_v0 }
  0x4c   :  { %1076 = vmatprep.subr.bf16.mxu0 %v1075_v34  ;;  %1035 = vmatmul.mubr.msk.f32.vlgmr.msra.gmra.mrb[0].mxu0 %vm105_vm0, %v82_v35  ;;  %v321_v25 = vld [vmem:[#allocation6 + $0x160] sm:$0xff]  ;;  %v328_v28 = vld [vmem:[#allocation6 + $0x198] sm:$0xff]  ;;  %v62_v30 = vld [vmem:[#allocation3 + $0x12] sm:$0xff]  ;;  %522 = vst.msk [vmem:[#allocation2 + $0x17] ss:$8 sm:$0x3] %vm519_vm1, %v1327_v0 }
  0x4d   :  { %1078 = vmatpush1.bf16.msra.mxu0 %v1077_v36  ;;  %188 = vmatprep.mubr.f32.mxu0 %v1327_v0  ;;  %v1101_v29 = vpack.c.bf16 %v323_v26, %v321_v25  ;;  %v1103_v31 = vpack.c.bf16 %v328_v28, %v326_v27  ;;  %v325_v32 = vld [vmem:[#allocation6 + $0x180] sm:$0xff]  ;;  %v327_v33 = vld [vmem:[#allocation6 + $0x190] sm:$0xff]  ;;  %v330_v36 = vld [vmem:[#allocation6 + $0x1a8] sm:$0xff] }
  0x4e   :  { %1080 = vmatprep.subr.bf16.mxu0 %v1079_v37  ;;  %1142 = vmatpush1.bf16.msra.mxu1 %v1141_v2  ;;  %v1105_v34 = vpack.c.bf16 %v327_v33, %v325_v32  ;;  %v63_v35 = vld [vmem:[#allocation3 + $0x1a] sm:$0xff]  ;;  %v614_v37 = vld [vmem:[#allocation8 + $0x90] sm:$0xff]  ;;  %v615_v38 = vld [vmem:[#allocation8 + $0x98] sm:$0xff] }
  0x4f   :  { %1143 = vmatprep.subr.bf16.mxu1 %v1328_v1  ;;  %v329_v39 = vld [vmem:[#allocation6 + $0x1a0] sm:$0xff]  ;;  %v1108_v41 = vpack.c.bf16 %v615_v38, %v614_v37  ;;  %v619_v47 = vld [vmem:[#allocation8 + $0xb8] sm:$0xff]  ;;  %v620_v50 = vld [vmem:[#allocation8 + $0xc0] sm:$0xff] }
  0x50   :  { %1036 = vmatmul.mubr.msk.f32.gmra.mrb[2].mxu0 %vm105_vm0, %v83_v43  ;;  %v308_v40 = vld [vmem:[#allocation3 + $0x2] sm:$0xff]  ;;  %v309_v44 = vld [vmem:[#allocation3 + $0xa] sm:$0xff]  ;;  %v310_v48 = vld [vmem:[#allocation3 + $0x14] sm:$0xff] }
  0x51   :  { %1082 = vmatpush1.bf16.msra.mxu0 %v1081_v42  ;;  %194 = vmatprep.mubr.f32.mxu0 %v1327_v0  ;;  %v616_v42 = vld [vmem:[#allocation8 + $0xa0] sm:$0xff]  ;;  %v617_v43 = vld [vmem:[#allocation8 + $0xa8] sm:$0xff]  ;;  %v601_v2 = vld [vmem:[#allocation8 + $0x50] sm:$0xff] }
  0x52   :  { %1084 = vmatprep.subr.bf16.mxu0 %v1083_v46  ;;  %1145 = vmatpush1.bf16.msra.mxu1 %v1144_v19  ;;  %v1111_v45 = vpack.c.bf16 %v617_v43, %v616_v42  ;;  %v618_v46 = vld [vmem:[#allocation8 + $0xb0] sm:$0xff]  ;;  %v621_v51 = vld [vmem:[#allocation8 + $0xc8] sm:$0xff]  ;;  %v599_v58 = vld [vmem:[#allocation8 + $0x40] sm:$0xff] }
  0x53   :  { %1146 = vmatprep.subr.bf16.mxu1 %v1328_v1  ;;  %v1114_v49 = vpack.c.bf16 %v619_v47, %v618_v46  ;;  %v311_v52 = vld [vmem:[#allocation3 + $0x1c] sm:$0xff]  ;;  %v1117_v53 = vpack.c.bf16 %v621_v51, %v620_v50  ;;  %v626_v5 = vld [vmem:[#allocation8 + $0xf0] sm:$0xff]  ;;  %v627_v6 = vld [vmem:[#allocation8 + $0xf8] sm:$0xff] }
  0x54   :  { %1037 = vmatmul.mubr.msk.f32.gmra.mrb[4].mxu0 %vm105_vm0, %v84_v55  ;;  %v623_v55 = vld [vmem:[#allocation8 + $0xd8] sm:$0xff]  ;;  %v600_v59 = vld [vmem:[#allocation8 + $0x48] sm:$0xff]  ;;  %v624_v61 = vld [vmem:[#allocation8 + $0xe0] sm:$0xff]  ;;  %v1126_v7 = vpack.c.bf16 %v627_v6, %v626_v5 }
  0x55   :  { %1086 = vmatpush1.bf16.msra.mxu0 %v1085_v54  ;;  %200 = vmatprep.mubr.f32.mxu0 %v1327_v0  ;;  %v622_v54 = vld [vmem:[#allocation8 + $0xd0] sm:$0xff]  ;;  %v1147_v60 = vpack.c.bf16 %v600_v59, %v599_v58  ;;  %v603_v8 = vld [vmem:[#allocation8 + $0x60] sm:$0xff]  ;;  %v629_v11 = vld [vmem:[#allocation8 + $0x108] sm:$0xff] }
  0x56   :  { %1088 = vmatprep.subr.bf16.mxu0 %v1087_v56  ;;  %v1120_v56 = vpack.c.bf16 %v623_v55, %v622_v54  ;;  %v628_v10 = vld [vmem:[#allocation8 + $0x100] sm:$0xff]  ;;  %v631_v17 = vld [vmem:[#allocation8 + $0x118] sm:$0xff]  ;;  %v608_v20 = vld [vmem:[#allocation8 + $0x88] sm:$0xff] }
  0x57   :  { %1148 = vmatpush1.bf16.msra.mxu1 %v1147_v60  ;;  %v607_v19 = vld [vmem:[#allocation8 + $0x80] sm:$0xff]  ;;  %v542_v5 = vld [vmem:[#allocation2 + $0x10] sm:$0x80] }
  0x58   :  { %1038 = vmatmul.mubr.msk.f32.gmra.mrb[6].mxu0 %vm105_vm0, %v85_v63  ;;  %1149 = vmatprep.subr.bf16.mxu1 %v1328_v1  ;;  %v1159_v21 = vpack.c.bf16 %v608_v20, %v607_v19 }
  0x59   :  { %1090 = vmatpush1.bf16.msra.mxu0 %v1089_v62  ;;  %283 = vmatprep.mubr.f32.mxu0 %v1327_v0  ;;  %v625_v62 = vld [vmem:[#allocation8 + $0xe8] sm:$0xff] }
  0x5a   :  { %235 = vmatprep.subr.mxu0 %v81_v3  ;;  %v1123_v63 = vpack.c.bf16 %v625_v62, %v624_v61  ;;  %v602_v3 = vld [vmem:[#allocation8 + $0x58] sm:$0xff] }
  0x5b   :  { %v1150_v4 = vpack.c.bf16 %v602_v3, %v601_v2 }
  0x5d   :  { %236 = vmatpush1.msra.mxu0 %v80_v12  ;;  %1151 = vmatpush1.bf16.msra.mxu1 %v1150_v4  ;;  %v1129_v12 = vpack.c.bf16 %v629_v11, %v628_v10  ;;  %v870_v10 = vld [vmem:[#allocation8 + $0x120] sm:$0xff]  ;;  %v871_v11 = vld [vmem:[#allocation8 + $0x128] sm:$0xff] }
  0x5e   :  { %1092 = vmatprep.subr.bf16.mxu0 %v1091_v13  ;;  %1039 = vmatmul.mubr.msk.f32.vlgmr.msra.gmra.mrb[0].mxu0 %vm105_vm0, %v60_v14  ;;  %v605_v13 = vld [vmem:[#allocation8 + $0x70] sm:$0xff]  ;;  %v606_v14 = vld [vmem:[#allocation8 + $0x78] sm:$0xff]  ;;  %v1162_v20 = vpack.c.bf16 %v871_v11, %v870_v10 }
  0x5f   :  { %1094 = vmatpush1.bf16.msra.mxu0 %v1093_v15  ;;  %289 = vmatprep.mubr.f32.mxu0 %v1327_v0  ;;  %v1156_v15 = vpack.c.bf16 %v606_v14, %v605_v13  ;;  %v884_v10 = vld [vmem:[#allocation8 + $0x190] sm:$0xff]  ;;  %v885_v11 = vld [vmem:[#allocation8 + $0x198] sm:$0xff] }
  0x60   :  { %1096 = vmatprep.subr.bf16.mxu0 %v1095_v16  ;;  %1152 = vmatprep.subr.bf16.mxu1 %v1328_v1  ;;  %v630_v16 = vld [vmem:[#allocation8 + $0x110] sm:$0xff] }
  0x61   :  { %v1132_v18 = vpack.c.bf16 %v631_v17, %v630_v16 }
  0x62   :  { %1040 = vmatmul.mubr.msk.f32.gmra.mrb[2].mxu0 %vm105_vm0, %v61_v23 }
  0x63   :  { %1098 = vmatpush1.bf16.msra.mxu0 %v1097_v22  ;;  %295 = vmatprep.mubr.f32.mxu0 %v1327_v0  ;;  %v1444_v22 = vshrl.u32 %v441_v57, 7 }
  0x64   :  { %1100 = vmatprep.subr.bf16.mxu0 %v1099_v24  ;;  %v1450_v24 = vld [vmem:[%s1549_s3] sm:$0xff]  ;;  %s1329_s3 = smov [#allocation9]  }
  0x65   :  { %v443_v23 = vsub.s32 0, %v1444_v22  ;;  %v447_v25 = vsub.s32 4, %v1444_v22  ;;  %v469_v26 = vsub.s32 1, %v1444_v22  ;;  %v473_v27 = vsub.s32 5, %v1444_v22  ;;  %s1022_s28 = sshll.u32 %s1329_s3, 4  ;;  %s1023_s28 = int_to_ptr.vmem [resolvable:$true] %s1022_s28 }
  0x66   :  { %1041 = vmatmul.mubr.msk.f32.gmra.mrb[4].mxu0 %vm105_vm0, %v62_v30  ;;  %s1292_s29 = scalar_lea.vmem %s1023_s28, 512  ;;  %p1297_p11 = scmp.lt.s32.totalorder %s1023_s28, %s1023_s28 }
  0x67   :  { %1102 = vmatpush1.bf16.msra.mxu0 %v1101_v29  ;;  %301 = vmatprep.mubr.f32.mxu0 %v1327_v0  ;;  %v444_v28 = vrot.slane %v1450_v24, %v443_v23  ;;  %v448_v29 = vrot.slane %v1450_v24, %v447_v25  ;;  %v470_v30 = vrot.slane %v1450_v24, %v469_v26  ;;  %p1293_p10 = scmp.ne.s32.totalorder %s1023_s28, %s1292_s29  ;;  %p1298_p12 = scmp.lt.s32.totalorder %s1292_s29, %s1292_s29 }
  0x68   :  { %1104 = vmatprep.subr.bf16.mxu0 %v1103_v31  ;;  %v474_v31 = vrot.slane %v1450_v24, %v473_v27  ;;  %v873_v27 = vld [vmem:[#allocation8 + $0x138] sm:$0xff] }
  0x69   :  { %v454_v32 = vrot.slane %v444_v28, %v443_v23  ;;  %v458_v33 = vrot.slane %v448_v29, %v443_v23  ;;  %p1299_p13 = por %p1298_p12, %p1297_p11 }
  0x6a   :  { %1042 = vmatmul.mubr.msk.f32.gmra.mrb[6].mxu0 %vm105_vm0, %v63_v35 }
  0x6b   :  { %1106 = vmatpush1.bf16.msra.mxu0 %v1105_v34  ;;  %407 = vmatprep.mubr.f32.mxu0 %v1327_v0  ;;  %v480_v34 = vrot.slane %v470_v30, %v469_v26  ;;  %p1300_p0 = pnand %p1299_p13, %p1293_p10 }
  0x6c   :  { %359 = vmatprep.subr.mxu0 %v330_v36  ;;  %v484_v36 = vrot.slane %v474_v31, %v469_v26  ;;  %v872_v26 = vld [vmem:[#allocation8 + $0x130] sm:$0xff] }
  0x6f   :  { %360 = vmatpush1.msra.mxu0 %v329_v39 }
  0x70   :  { %1043 = vmatmul.mubr.msk.f32.vlgmr.msra.gmra.mrb[0].mxu0 %vm105_vm0, %v308_v40  ;;  %1107 = vmatprep.subr.bf16.mxu0 %v1328_v1 }
  0x71   :  { %413 = vmatprep.mubr.f32.mxu0 %v1327_v0  ;;  %1109 = vmatpush1.bf16.msra.mxu0 %v1108_v41 }
  0x72   :  { %1110 = vmatprep.subr.bf16.mxu0 %v1328_v1 }
  0x74   :  { %1044 = vmatmul.mubr.msk.f32.gmra.mrb[2].mxu0 %vm105_vm0, %v309_v44 }
  0x75   :  { %419 = vmatprep.mubr.f32.mxu0 %v1327_v0  ;;  %1112 = vmatpush1.bf16.msra.mxu0 %v1111_v45 }
  0x76   :  { %1113 = vmatprep.subr.bf16.mxu0 %v1328_v1 }
  0x78   :  { %1045 = vmatmul.mubr.msk.f32.gmra.mrb[4].mxu0 %vm105_vm0, %v310_v48 }
  0x79   :  { %425 = vmatprep.mubr.f32.mxu0 %v1327_v0  ;;  %1115 = vmatpush1.bf16.msra.mxu0 %v1114_v49  ;;  %v604_v0 = vld [vmem:[#allocation8 + $0x68] sm:$0xff] }
  0x7a   :  { %1116 = vmatprep.subr.bf16.mxu0 %v1328_v1  ;;  %v1153_v9 = vpack.c.bf16 %v604_v0, %v603_v8 }
  0x7c   :  { %1046 = vmatmul.mubr.msk.f32.gmra.mrb[6].mxu0 %vm105_vm0, %v311_v52  ;;  %1154 = vmatpush1.bf16.msra.mxu1 %v1153_v9 }
  0x7d   :  { %1118 = vmatpush1.bf16.msra.mxu0 %v1117_v53  ;;  %1155 = vmatprep.subr.bf16.mxu1 %v1328_v1 }
  0x7e   :  { %1119 = vmatprep.subr.bf16.mxu0 %v1328_v1 }
  0x80   :  { %1157 = vmatpush1.bf16.msra.mxu1 %v1156_v15  ;;  %v561_v15 = vrot.slane %v542_v5, 7  ;;  %v880_v5 = vld [vmem:[#allocation8 + $0x170] sm:$0xff] }
  0x81   :  { %1121 = vmatpush1.bf16.msra.mxu0 %v1120_v56  ;;  %1158 = vmatprep.subr.bf16.mxu1 %v1328_v1 }
  0x82   :  { %1122 = vmatprep.subr.bf16.mxu0 %v1328_v1 }
  0x84   :  { %1160 = vmatpush1.bf16.msra.mxu1 %v1159_v21 }
  0x85   :  { %1124 = vmatpush1.bf16.msra.mxu0 %v1123_v63  ;;  %1161 = vmatprep.subr.bf16.mxu1 %v1328_v1  ;;  %v543_v63 = vld [vmem:[#allocation2 + $0x18] sm:$0x80] }
  0x86   :  { %1125 = vmatprep.subr.bf16.mxu0 %v1328_v1  ;;  %v564_v9 = vrot.slane %v543_v63, 7  ;;  %v879_v63 = vld [vmem:[#allocation8 + $0x168] sm:$0xff] }
  0x89   :  { %1127 = vmatpush1.bf16.msra.mxu0 %v1126_v7 }
  0x8a   :  { %1128 = vmatprep.subr.bf16.mxu0 %v1328_v1 }
  0x8d   :  { %1130 = vmatpush1.bf16.msra.mxu0 %v1129_v12 }
  0x8e   :  { %1131 = vmatprep.subr.bf16.mxu0 %v1328_v1 }
  0x91   :  { %1133 = vmatpush1.bf16.msra.mxu0 %v1132_v18 }
 0x143   :  { %v409_v35 = vpop.f32.mrb[0].mxu0 }
 0x144   :  { %v459_v37 = vmul.f32 %v454_v32, %v409_v35  ;;  %v411_v38 = vpop.f32.mrb[1].mxu0  ;;  %v548_v35 = vld [vmem:[#allocation2 + $0x70] sm:$0x80] }
 0x145   :  { %v460_v39 = vmul.f32 %v458_v33, %v411_v38 }
 0x146   :  { %v485_v40 = vadd.f32 %v480_v34, %v459_v37 }
 0x147   :  { %v486_v41 = vadd.f32 %v484_v36, %v460_v39  ;;  %v415_v42 = vpop.f32.mrb[2].mxu0  ;;  %v874_v39 = vld [vmem:[#allocation8 + $0x140] sm:$0xff] }
 0x148   :  { %vm493_vm2 = vcmp.gt.f32.partialorder %v485_v40, 0.0  ;;  %v501_v43 = vmul.f32 0.01, %v485_v40  ;;  %v461_v44 = vmul.f32 %v454_v32, %v415_v42  ;;  %v417_v45 = vpop.f32.mrb[3].mxu0 }
 0x149   :  { %vm494_vm3 = vcmp.gt.f32.partialorder %v486_v41, 0.0  ;;  %v502_v46 = vmul.f32 0.01, %v486_v41  ;;  %v462_v47 = vmul.f32 %v458_v33, %v417_v45 }
 0x14a   :  { %v1459_v48 = vsel %vm493_vm2, %v485_v40, %v501_v43  ;;  %v487_v49 = vadd.f32 %v480_v34, %v461_v44  ;;  %v875_v40 = vld [vmem:[#allocation8 + $0x148] sm:$0xff]  ;;  %v579_v44 = vrot.slane %v548_v35, 7 }
 0x14b   :  { %527 = vst [vmem:[#allocation2 + $0x20] sm:$0xff] %v1459_v48  ;;  %v510_v50 = vsel %vm494_vm3, %v486_v41, %v502_v46  ;;  %v488_v51 = vadd.f32 %v484_v36, %v462_v47  ;;  %v421_v52 = vpop.f32.mrb[4].mxu0  ;;  %v562_v16 = vrot.slane %v1459_v48, 7  ;;  %v1168_v46 = vpack.c.bf16 %v875_v40, %v874_v39  ;;  %v830_v35 = vld [vmem:[#allocation2 + $0xa0] sm:$0x1] }
 0x14c   :  { %529 = vst.msk [vmem:[#allocation2 + $0x28] sm:$0xff] %vm528_vm4, %v510_v50  ;;  %vm495_vm5 = vcmp.gt.f32.partialorder %v487_v49, 0.0  ;;  %v503_v53 = vmul.f32 0.01, %v487_v49  ;;  %v463_v54 = vmul.f32 %v454_v32, %v421_v52  ;;  %v423_v55 = vpop.f32.mrb[5].mxu0  ;;  %v877_v50 = vld [vmem:[#allocation8 + $0x158] sm:$0xff] }
 0x14d   :  { %vm496_vm6 = vcmp.gt.f32.partialorder %v488_v51, 0.0  ;;  %v504_v56 = vmul.f32 0.01, %v488_v51  ;;  %v464_v57 = vmul.f32 %v458_v33, %v423_v55  ;;  %v563_v30 = vsel %vm560_vm10, %v561_v15, %v562_v16 }
 0x14e   :  { %v1463_v58 = vsel %vm495_vm5, %v487_v49, %v503_v53  ;;  %v489_v59 = vadd.f32 %v480_v34, %v463_v54  ;;  %v876_v49 = vld [vmem:[#allocation8 + $0x150] sm:$0xff] }
 0x14f   :  { %530 = vst [vmem:[#allocation2 + $0x30] sm:$0xff] %v1463_v58  ;;  %v512_v60 = vsel %vm496_vm6, %v488_v51, %v504_v56  ;;  %v490_v61 = vadd.f32 %v484_v36, %v464_v57  ;;  %v427_v62 = vpop.f32.mrb[6].mxu0 }
 0x150   :  { %531 = vst.msk [vmem:[#allocation2 + $0x38] sm:$0xff] %vm528_vm4, %v512_v60  ;;  %vm497_vm7 = vcmp.gt.f32.partialorder %v489_v59, 0.0  ;;  %v505_v2 = vmul.f32 0.01, %v489_v59  ;;  %v465_v3 = vmul.f32 %v454_v32, %v427_v62  ;;  %v429_v4 = vpop.f32.mrb[7].mxu0  ;;  %v878_v62 = vld [vmem:[#allocation8 + $0x160] sm:$0xff] }
 0x151   :  { %vm498_vm8 = vcmp.gt.f32.partialorder %v490_v61, 0.0  ;;  %v506_v6 = vmul.f32 0.01, %v490_v61  ;;  %v466_v7 = vmul.f32 %v458_v33, %v429_v4  ;;  %v549_v33 = vld [vmem:[#allocation2 + $0x78] sm:$0x80]  ;;  %v1174_v4 = vpack.c.bf16 %v879_v63, %v878_v62 }
 0x152   :  { %v1467_v8 = vsel %vm497_vm7, %v489_v59, %v505_v2  ;;  %v491_v0 = vadd.f32 %v480_v34, %v465_v3  ;;  %v582_v38 = vrot.slane %v549_v33, 7  ;;  %v1171_v59 = vpack.c.bf16 %v877_v50, %v876_v49  ;;  %v820_v15 = vld [vmem:[#allocation2 + $0x20] sm:$0xfe] }
 0x153   :  { %538 = vst [vmem:[#allocation2 + $0x80] sm:$0xff] %v1467_v8  ;;  %v514_v12 = vsel %vm498_vm8, %v490_v61, %v506_v6  ;;  %v492_v13 = vadd.f32 %v484_v36, %v466_v7  ;;  %v545_v14 = vld [vmem:[#allocation2 + $0x28] sm:$0xff]  ;;  %v1165_v36 = vpack.c.bf16 %v873_v27, %v872_v26  ;;  %v580_v43 = vrot.slane %v1467_v8, 7  ;;  %v881_v6 = vld [vmem:[#allocation8 + $0x178] sm:$0xff] }
 0x154   :  { %539 = vst.msk [vmem:[#allocation2 + $0x88] sm:$0xff] %vm528_vm4, %v514_v12  ;;  %vm499_vm9 = vcmp.gt.f32.partialorder %v491_v0, 0.0  ;;  %v507_v17 = vmul.f32 0.01, %v491_v0  ;;  %v565_v18 = vrot.slane %v545_v14, 7  ;;  %1047 = vmatprep.mubr.msk.f32.mxu0 %vm528_vm4, %v545_v14  ;;  %v1177_v7 = vpack.c.bf16 %v881_v6, %v880_v5  ;;  %v887_v14 = vld [vmem:[#allocation8 + $0x1a8] sm:$0xff] }
 0x155   :  { %vm500_vm11 = vcmp.gt.f32.partialorder %v492_v13, 0.0  ;;  %v508_v19 = vmul.f32 0.01, %v492_v13  ;;  %707 = vmatmul.mubr.f32.vlgmr.msra.gmra.mrb[8].mxu0 %v1459_v48  ;;  %v581_v52 = vsel %vm560_vm10, %v579_v44, %v580_v43  ;;  %v821_v55 = vld [vmem:[#allocation2 + $0x28] sm:$0xfe]  ;;  %v1183_v12 = vpack.c.bf16 %v885_v11, %v884_v10 }
 0x156   :  { %v1474_v21 = vsel %vm499_vm9, %v491_v0, %v507_v17  ;;  %v566_v23 = vsel %vm560_vm10, %v564_v9, %v565_v18  ;;  %v546_v25 = vld [vmem:[#allocation2 + $0x30] sm:$0x7f]  ;;  %v842_v61 = vrot.slane %v821_v55, 1  ;;  %v883_v0 = vld [vmem:[#allocation8 + $0x188] sm:$0xff]  ;;  %v825_v17 = vld [vmem:[#allocation2 + $0x48] sm:$0x1] }
 0x157   :  { %540 = vst [vmem:[#allocation2 + $0x90] sm:$0xff] %v1474_v21  ;;  %v516_v28 = vsel %vm500_vm11, %v492_v13, %v508_v19  ;;  %1051 = vmatprep.mubr.msk.f32.mxu1 %vm528_vm4, %v566_v23  ;;  %v1479_v29 = vld [vmem:[#allocation2 + $0x38] sm:$0xff]  ;;  %v567_v32 = vrot.slane %v546_v25, 7  ;;  %v847_v19 = vrot.slane %v825_v17, 1  ;;  %v840_v23 = vrot.slane %v1463_v58, 1 }
 0x158   :  { %v547_v31 = vld [vmem:[#allocation2 + $0x38] sm:$0x7f]  ;;  %541 = vst.msk [vmem:[#allocation2 + $0x98] sm:$0xff] %vm528_vm4, %v516_v28  ;;  %1048 = vmatprep.mubr.msk.f32.mxu0 %vm528_vm4, %v1479_v29  ;;  %800 = vmatmul.mubr.f32.vlgmr.msra.gmra.mrb[0].mxu1 %v563_v30  ;;  %v843_v57 = vrot.slane %v1479_v29, 1  ;;  %v995_v49 = vsub.s32 3, %v1444_v22 }
 0x159   :  { %v569_v34 = vrot.slane %v547_v31, 7  ;;  %1163 = vmatpush1.bf16.msra.mxu1 %v1162_v20  ;;  %712 = vmatmul.mubr.f32.gmra.mrb[10].mxu0 %v1463_v58  ;;  %v568_v42 = vsel %vm560_vm10, %v562_v16, %v567_v32  ;;  %v886_v13 = vld [vmem:[#allocation8 + $0x1a0] sm:$0xff]  ;;  %v824_v20 = vld [vmem:[#allocation2 + $0x40] sm:$0x1]  ;;  %v831_v31 = vld [vmem:[#allocation2 + $0xa8] sm:$0x1] }
 0x15a   :  { %1164 = vmatprep.subr.bf16.mxu1 %v1328_v1  ;;  %v844_v3 = vsel %vm838_vm12, %v842_v61, %v843_v57  ;;  %v1186_v16 = vpack.c.bf16 %v887_v14, %v886_v13  ;;  %v845_v26 = vrot.slane %v824_v20, 1  ;;  %v848_v28 = vsel %vm838_vm12, %v843_v57, %v847_v19  ;;  %v826_v30 = vld [vmem:[#allocation2 + $0x80] sm:$0xfe] }
 0x15b   :  { %v570_v37 = vsel %vm560_vm10, %v565_v18, %v569_v34  ;;  %v551_v41 = vld [vmem:[#allocation2 + $0x88] sm:$0xff]  ;;  %v839_v18 = vrot.slane %v820_v15, 1  ;;  %v857_v33 = vrot.slane %v826_v30, 1  ;;  %v865_v34 = vrot.slane %v831_v31, 1 }
 0x15c   :  { %1052 = vmatprep.mubr.msk.f32.mxu1 %vm528_vm4, %v570_v37  ;;  %v583_v45 = vrot.slane %v551_v41, 7  ;;  %1049 = vmatprep.mubr.msk.f32.mxu0 %vm528_vm4, %v551_v41  ;;  %v827_v27 = vld [vmem:[#allocation2 + $0x88] sm:$0xfe]  ;;  %v846_v32 = vsel %vm838_vm12, %v840_v23, %v845_v26 }
 0x15d   :  { %805 = vmatmul.mubr.f32.gmra.mrb[2].mxu1 %v568_v42  ;;  %717 = vmatmul.mubr.f32.gmra.mrb[12].mxu0 %v1467_v8  ;;  %v882_v8 = vld [vmem:[#allocation8 + $0x180] sm:$0xff]  ;;  %v841_v25 = vsel %vm838_vm12, %v839_v18, %v840_v23 }
 0x15e   :  { %1166 = vmatpush1.bf16.msra.mxu1 %v1165_v36  ;;  %v584_v47 = vsel %vm560_vm10, %v582_v38, %v583_v45  ;;  %v552_v48 = vld [vmem:[#allocation2 + $0x90] sm:$0x7f]  ;;  %v1180_v9 = vpack.c.bf16 %v883_v0, %v882_v8  ;;  %v858_v36 = vrot.slane %v1474_v21, 1  ;;  %v863_v38 = vrot.slane %v830_v35, 1 }
 0x15f   :  { %1167 = vmatprep.subr.bf16.mxu1 %v1328_v1  ;;  %1053 = vmatprep.mubr.msk.f32.mxu1 %vm528_vm4, %v584_v47  ;;  %v1496_v51 = vld [vmem:[#allocation2 + $0x98] sm:$0xff]  ;;  %v585_v54 = vrot.slane %v552_v48, 7 }
 0x160   :  { %v553_v53 = vld [vmem:[#allocation2 + $0x98] sm:$0x7f]  ;;  %1050 = vmatprep.mubr.msk.f32.mxu0 %vm528_vm4, %v1496_v51  ;;  %v861_v29 = vrot.slane %v1496_v51, 1  ;;  %v859_v37 = vsel %vm838_vm12, %v857_v33, %v858_v36  ;;  %v864_v40 = vsel %vm838_vm12, %v858_v36, %v863_v38 }
 0x161   :  { %810 = vmatmul.mubr.f32.gmra.mrb[4].mxu1 %v581_v52  ;;  %v587_v56 = vrot.slane %v553_v53, 7  ;;  %722 = vmatmul.mubr.f32.gmra.mrb[14].mxu0 %v1474_v21  ;;  %v586_v2 = vsel %vm560_vm10, %v580_v43, %v585_v54  ;;  %v987_v21 = vsub.s32 2, %v1444_v22  ;;  %v996_v53 = vrot.slane %v1450_v24, %v995_v49 }
 0x162   :  { %1169 = vmatpush1.bf16.msra.mxu1 %v1168_v46  ;;  %v866_v39 = vsel %vm838_vm12, %v861_v29, %v865_v34 }
 0x163   :  { %v588_v60 = vsel %vm560_vm10, %v583_v45, %v587_v56  ;;  %1170 = vmatprep.subr.bf16.mxu1 %v1328_v1  ;;  %v988_v50 = vrot.slane %v1450_v24, %v987_v21 }
 0x164   :  { %1054 = vmatprep.mubr.msk.f32.mxu1 %vm528_vm4, %v588_v60 }
 0x165   :  { %815 = vmatmul.mubr.f32.gmra.mrb[6].mxu1 %v586_v2 }
 0x166   :  { %1172 = vmatpush1.bf16.msra.mxu1 %v1171_v59  ;;  %1055 = vmatprep.mubr.msk.f32.mxu1 %vm528_vm4, %v844_v3 }
 0x167   :  { %1173 = vmatprep.subr.bf16.mxu1 %v1328_v1 }
 0x16a   :  { %1175 = vmatpush1.bf16.msra.mxu1 %v1174_v4 }
 0x16b   :  { %1176 = vmatprep.subr.bf16.mxu1 %v1328_v1 }
 0x16e   :  { %1178 = vmatpush1.bf16.msra.mxu1 %v1177_v7 }
 0x16f   :  { %1179 = vmatprep.subr.bf16.mxu1 %v1328_v1 }
 0x172   :  { %1181 = vmatpush1.bf16.msra.mxu1 %v1180_v9 }
 0x173   :  { %1182 = vmatprep.subr.bf16.mxu1 %v1328_v1 }
 0x176   :  { %1184 = vmatpush1.bf16.msra.mxu1 %v1183_v12 }
 0x177   :  { %1185 = vmatprep.subr.bf16.mxu1 %v1328_v1  ;;  %v860_v1 = vrot.slane %v827_v27, 1 }
 0x179   :  { %v862_v58 = vsel %vm838_vm12, %v860_v1, %v861_v29 }
 0x17a   :  { %1187 = vmatpush1.bf16.msra.mxu1 %v1186_v16 }
 0x17d   :  { %961 = vmatmul.mubr.f32.vlgmr.msra.gmra.mrb[0].mxu1 %v841_v25 }
 0x17e   :  { %1056 = vmatprep.mubr.msk.f32.mxu1 %vm528_vm4, %v848_v28 }
 0x181   :  { %966 = vmatmul.mubr.f32.gmra.mrb[2].mxu1 %v846_v32 }
 0x182   :  { %1057 = vmatprep.mubr.msk.f32.mxu1 %vm528_vm4, %v862_v58 }
 0x185   :  { %971 = vmatmul.mubr.f32.gmra.mrb[4].mxu1 %v859_v37 }
 0x186   :  { %1058 = vmatprep.mubr.msk.f32.mxu1 %vm528_vm4, %v866_v39 }
 0x189   :  { %976 = vmatmul.mubr.f32.gmra.mrb[6].mxu1 %v864_v40 }
 0x228   :  { %v708_v41 = vpop.f32.mrb[8].mxu0 }
 0x229   :  { %v710_v42 = vpop.f32.mrb[9].mxu0 }
 0x22c   :  { %v713_v43 = vpop.f32.mrb[10].mxu0 }
 0x22d   :  { %v715_v44 = vpop.f32.mrb[11].mxu0 }
 0x230   :  { %v718_v45 = vpop.f32.mrb[12].mxu0 }
 0x231   :  { %v720_v46 = vpop.f32.mrb[13].mxu0 }
 0x234   :  { %v723_v47 = vpop.f32.mrb[14].mxu0 }
 0x235   :  { %v725_v48 = vpop.f32.mrb[15].mxu0 }
 0x250   :  { %v962_v51 = vpop.f32.mrb[0].mxu1 }
 0x251   :  { %v1188_v52 = vadd.f32 %v962_v51, %v708_v41  ;;  %v964_v54 = vpop.f32.mrb[1].mxu1 }
 0x253   :  { %v989_v55 = vmul.f32 %v1188_v52, %v988_v50 }
 0x254   :  { %v967_v56 = vpop.f32.mrb[2].mxu1 }
 0x255   :  { %v997_v57 = vadd.f32 %v996_v53, %v989_v55  ;;  %v1189_v59 = vadd.f32 %v967_v56, %v713_v43  ;;  %v969_v60 = vpop.f32.mrb[3].mxu1 }
 0x257   :  { %vm1001_vm13 = vcmp.gt.f32.partialorder %v997_v57, 0.0  ;;  %v1005_v61 = vmul.f32 0.01, %v997_v57  ;;  %v990_v62 = vmul.f32 %v1189_v59, %v988_v50 }
 0x258   :  { %v972_v63 = vpop.f32.mrb[4].mxu1 }
 0x259   :  { %v1009_v2 = vsel %vm1001_vm13, %v997_v57, %v1005_v61  ;;  %v998_v3 = vadd.f32 %v996_v53, %v990_v62  ;;  %v1190_v4 = vadd.f32 %v972_v63, %v718_v45  ;;  %v974_v22 = vpop.f32.mrb[5].mxu1 }
 0x25a   :  { %1013 = vst [vmem:[#allocation9] sm:$0xff] %v1009_v2 }
 0x25b   :  { %vm1002_vm14 = vcmp.gt.f32.partialorder %v998_v3, 0.0  ;;  %v1006_v5 = vmul.f32 0.01, %v998_v3  ;;  %v991_v6 = vmul.f32 %v1190_v4, %v988_v50 }
 0x25c   :  { %v977_v7 = vpop.f32.mrb[6].mxu1 }
 0x25d   :  { %v1010_v24 = vsel %vm1002_vm14, %v998_v3, %v1006_v5  ;;  %v999_v8 = vadd.f32 %v996_v53, %v991_v6  ;;  %v1191_v0 = vadd.f32 %v977_v7, %v723_v47  ;;  %v979_v9 = vpop.f32.mrb[7].mxu1 }
 0x25e   :  { %1014 = vst [vmem:[#allocation9 + $0x8] sm:$0xff] %v1010_v24 }
 0x25f   :  { %vm1003_vm15 = vcmp.gt.f32.partialorder %v999_v8, 0.0  ;;  %v1007_v10 = vmul.f32 0.01, %v999_v8  ;;  %v992_v11 = vmul.f32 %v1191_v0, %v988_v50 }
 0x261   :  { %v1011_v12 = vsel %vm1003_vm15, %v999_v8, %v1007_v10  ;;  %v1000_v13 = vadd.f32 %v996_v53, %v992_v11 }
 0x262   :  { %1015 = vst [vmem:[#allocation9 + $0x10] sm:$0xff] %v1011_v12 }
 0x263   :  { %vm1004_vm0 = vcmp.gt.f32.partialorder %v1000_v13, 0.0  ;;  %v1008_v14 = vmul.f32 0.01, %v1000_v13 }
 0x265   :  { %v1012_v15 = vsel %vm1004_vm0, %v1000_v13, %v1008_v14 }
 0x266   :  { %1016 = vst [vmem:[#allocation9 + $0x18] sm:$0xff] %v1012_v15 }
 0x267   :  { %1303 = shalt.err (!%p1300_p0)
}
 0x268   :  { %s1304_s6 = scalar_lea.hbm %s1550_s4, 512 }
 0x269   :  { %p1305_p1 = scmp.ne.s32.totalorder %s1550_s4, %s1304_s6  ;;  %p1308_p2 = scmp.lt.u32.totalorder %s1304_s6, %s1550_s4 }
 0x26b   :  { %p1310_p3 = pnand %p1308_p2, %p1305_p1 }
 0x26d   :  { %1313 = shalt.err (!%p1310_p3)
}
 0x26e   :  { %1028 = dma.vmem_to_hbm [thread:$0]  %s1023_s28, 512, %s1550_s4, [#allocation5], %s1324_s1, %s1324_s1, %s1325_s13  }
 0x26f   :  { %1318 = dma.done.wait [#allocation5], 512  }
 0x270   :  { %1319 = vsyncadd [#allocation5], 4294966784 }
 0x271   :  { %1032 = vsyncpa [#allocation4], 1 }
 0x272   :  { %1033 = vsyncpa [#allocation7], 1 }
 0x273   :  { %1034 = vsyncpa [#allocation5], 1 }

</bundles_post_ra>
